<compile_context>
chip_gen: v6e
topology: v6e:2x2x1
jax: 0.10.0
libtpu: 0.0.40
codegen_flags: <defaults>
</compile_context>

<pallas_src>
import functools

import jax
import jax.numpy as jnp
from jax import lax
from jax.experimental import pallas as pl
from jax.experimental.pallas import tpu as pltpu


def _round_up(x: int, m: int) -> int:
    return (x + m - 1) // m * m


def _cdiv(a: int, b: int) -> int:
    return (a + b - 1) // b


# ----------------------------------------------------------------------------
# Small-M path: single output tile, operand deduped, in-kernel cast, split-K.
# ----------------------------------------------------------------------------
def _gram_small_kernel(x_ref, o_ref, acc_ref, *, inv_norm, compute_dtype):
    k = pl.program_id(1)

    @pl.when(k == 0)
    def _():
        acc_ref[...] = jnp.zeros_like(acc_ref)

    # Single operand: X tile used as both LHS and RHS (X @ X^T), cast in-kernel.
    a = x_ref[...].astype(compute_dtype)
    acc_ref[...] += lax.dot_general(
        a,
        a,
        dimension_numbers=(((1,), (1,)), ((), ())),   # A . A^T, MXU-native
        preferred_element_type=jnp.float32,
    )

    @pl.when(k == pl.num_programs(1) - 1)
    def _():
        o_ref[...] = acc_ref[...] * inv_norm


def _gram_small(x, M, HW, HW_128, inv_norm, compute_dtype):
    # Rows: >=16 sublanes (bf16 packing); lane-dense 128 once the extra padded
    # rows are cheap relative to streaming the HW axis.
    M_pad = _round_up(M, 16) if M < 64 else _round_up(M, 128)

    itemsize = jnp.dtype(x.dtype).itemsize

    # K tile from a VMEM budget: double-buffered operand tile <= ~24 MiB
    # (plus <=2 MiB out + <=1 MiB acc keeps us well under the 48 MiB limit,
    # which itself is inside v7x's 64 MiB physical VMEM).
    op_budget = 24 * 1024 * 1024
    tk_cap = max(512, min(8192, (op_budget // (2 * M_pad * itemsize)) // 128 * 128))
    tk0 = min(tk_cap, HW_128)

    # Balanced K tiling (no over-padding), then split-K for v7x megacore.
    gk = _cdiv(HW_128, tk0)
    n_split = 2 if gk >= 2 else 1
    gk = _round_up(gk, n_split)
    TK = _round_up(_cdiv(HW_128, gk), 128)
    HW_pad = TK * gk
    k_steps = gk // n_split

    pad_m, pad_hw = M_pad - M, HW_pad - HW
    if pad_m or pad_hw:
        x = jnp.pad(x, ((0, pad_m), (0, pad_hw)))
    # No wrapper-side cast: each K block is read exactly once, so casting inside
    # the kernel avoids a full extra HBM round trip.

    kernel = functools.partial(
        _gram_small_kernel, inv_norm=inv_norm, compute_dtype=compute_dtype
    )

    flops = 2 * M_pad * M_pad * HW_pad
    bytes_accessed = M_pad * HW_pad * itemsize + n_split * M_pad * M_pad * 4

    out = pl.pallas_call(
        kernel,
        out_shape=jax.ShapeDtypeStruct((n_split, M_pad, M_pad), jnp.float32),
        grid_spec=pltpu.PrefetchScalarGridSpec(
            num_scalar_prefetch=0,
            grid=(n_split, k_steps),
            in_specs=[
                # Single operand spec (dedup): block index along HW is the
                # split's K offset plus the inner K step.
                pl.BlockSpec((M_pad, TK), lambda s, k: (0, s * k_steps + k)),
            ],
            out_specs=pl.BlockSpec((None, M_pad, M_pad), lambda s, k: (s, 0, 0)),
            scratch_shapes=[pltpu.VMEM((M_pad, M_pad), jnp.float32)],
        ),
        compiler_params=pltpu.CompilerParams(
            dimension_semantics=("parallel", "arbitrary"),
            vmem_limit_bytes=48 * 1024 * 1024,
        ),
        cost_estimate=pl.CostEstimate(
            flops=flops, transcendentals=0, bytes_accessed=bytes_accessed
        ),
    )(x)

    gram = out[0] if n_split == 1 else jnp.sum(out, axis=0)
    return gram[:M, :M]


# ----------------------------------------------------------------------------
# Large-M path: upper-triangular tile iteration (Gram symmetry) + 512 tiles.
# ----------------------------------------------------------------------------
def _gram_tri_kernel(ti_ref, tj_ref, a_ref, b_ref, o_ref, acc_ref, *, inv_norm):
    # ti_ref / tj_ref are the scalar-prefetched tile tables; they are consumed
    # by the index_maps, not by the body.
    del ti_ref, tj_ref
    k = pl.program_id(1)

    @pl.when(k == 0)
    def _():
        acc_ref[...] = jnp.zeros_like(acc_ref)

    acc_ref[...] += lax.dot_general(
        a_ref[...],
        b_ref[...],
        dimension_numbers=(((1,), (1,)), ((), ())),   # A . B^T, MXU-native
        preferred_element_type=jnp.float32,
    )

    @pl.when(k == pl.num_programs(1) - 1)
    def _():
        o_ref[...] = acc_ref[...] * inv_norm


def _gram_large(x, M, HW, HW_128, inv_norm, compute_dtype):
    # Prefer 512x512 output tiles (halves operand refetch vs 256x256, ~11 MiB
    # VMEM) unless rounding M up to 512 wastes too much padding.
    if _round_up(M, 512) <= max(_round_up(M, 256), int(1.25 * M)):
        TM = TN = 512
    else:
        TM = TN = 256
    M_pad = _round_up(M, TM)

    # Balanced K tiling around a 2048 target (no round_up(HW, TK) over-pad).
    gk = _cdiv(HW_128, 2048)
    TK = _round_up(_cdiv(HW_128, gk), 128)
    HW_pad = TK * gk

    pad_m, pad_hw = M_pad - M, HW_pad - HW
    if pad_m or pad_hw:
        x = jnp.pad(x, ((0, pad_m), (0, pad_hw)))
    # Row-blocks are refetched many times here, so the one-off compact cast
    # (default bf16) halves HBM operand traffic and is worth the extra pass.
    x = x.astype(compute_dtype)

    nt = M_pad // TM
    # Upper-triangular (i <= j) tile list: Gram is symmetric, so compute only
    # ~half the tiles and mirror the rest in the wrapper.
    pairs = [(i, j) for i in range(nt) for j in range(i, nt)]
    ti = jnp.asarray([p[0] for p in pairs], dtype=jnp.int32)
    tj = jnp.asarray([p[1] for p in pairs], dtype=jnp.int32)
    n_tiles = len(pairs)

    kernel = functools.partial(_gram_tri_kernel, inv_norm=inv_norm)

    itemsize = jnp.dtype(x.dtype).itemsize
    flops = 2 * n_tiles * TM * TN * HW_pad
    bytes_accessed = 2 * n_tiles * TM * HW_pad * itemsize + n_tiles * TM * TN * 4

    out = pl.pallas_call(
        kernel,
        out_shape=jax.ShapeDtypeStruct((M_pad, M_pad), jnp.float32),
        grid_spec=pltpu.PrefetchScalarGridSpec(
            num_scalar_prefetch=2,
            grid=(n_tiles, gk),
            in_specs=[
                pl.BlockSpec((TM, TK), lambda t, k, ti, tj: (ti[t], k)),
                pl.BlockSpec((TN, TK), lambda t, k, ti, tj: (tj[t], k)),
            ],
            out_specs=pl.BlockSpec((TM, TN), lambda t, k, ti, tj: (ti[t], tj[t])),
            scratch_shapes=[pltpu.VMEM((TM, TN), jnp.float32)],
        ),
        compiler_params=pltpu.CompilerParams(
            # Tile axis uses data-dependent (prefetched) index maps; keep it
            # "arbitrary" (safe on all generations; near-zero impact on 1-TC
            # chips).
            dimension_semantics=("arbitrary", "arbitrary"),
            vmem_limit_bytes=48 * 1024 * 1024,
        ),
        cost_estimate=pl.CostEstimate(
            flops=flops, transcendentals=0, bytes_accessed=bytes_accessed
        ),
    )(ti, tj, x, x)

    # Mirror: lower-triangle tiles were never written (garbage); take the
    # transposed value from the corresponding valid upper tile instead.
    row_t = lax.broadcasted_iota(jnp.int32, (M_pad, M_pad), 0) // TM
    col_t = lax.broadcasted_iota(jnp.int32, (M_pad, M_pad), 1) // TN
    gram = jnp.where(row_t <= col_t, out, out.T)
    return gram[:M, :M]


# ----------------------------------------------------------------------------
# Public wrapper
# ----------------------------------------------------------------------------
def gram_matrix(mat: jax.Array, *, compute_dtype=jnp.bfloat16) -> jax.Array:
    """mat: (B, C, H, W) -> (B*C, B*C) float32 Gram matrix / (B*C*H*W).

    compute_dtype controls the MXU operand precision (default bf16; pass
    jnp.float32 for a full-precision path).  Accumulation is always f32.
    """
    B, C, H, W = mat.shape
    M = B * C
    HW = H * W
    inv_norm = 1.0 / float(B * C * H * W)

    x = mat.reshape(M, HW)
    HW_128 = _round_up(HW, 128)

    if M <= 512:
        return _gram_small(x, M, HW, HW_128, inv_norm, compute_dtype)
    return _gram_large(x, M, HW, HW_128, inv_norm, compute_dtype)


def gram_matrix_ref(mat: jax.Array) -> jax.Array:
    """Pure-JAX f32 reference matching the PyTorch semantics."""
    B, C, H, W = mat.shape
    collapsed = mat.reshape(B * C, H * W).astype(jnp.float32)
    return (collapsed @ collapsed.T) / (B * C * H * W)


if __name__ == "__main__":
    key = jax.random.PRNGKey(0)

    # --- Small-M path (typical style-transfer layer) ---
    B, C, H, W = 2, 4, 16, 16
    x = jax.random.normal(key, (B, C, H, W), dtype=jnp.float32)
    gram = jax.block_until_ready(gram_matrix(x))
    ref = jax.block_until_ready(gram_matrix_ref(x))
    assert gram.shape == (B * C, B * C), gram.shape
    # bf16 matmul operands (f32 accumulation) -> slightly loosened tolerance.
    assert jnp.allclose(gram, ref, rtol=2e-2, atol=1e-3), (gram, ref)

    # --- Large-M path (exercises the symmetric triangular-tile kernel) ---
    B2, C2, H2, W2 = 2, 288, 8, 8          # M = 576 > 512
    x2 = jax.random.normal(jax.random.PRNGKey(0), (B2, C2, H2, W2), jnp.float32)
    gram2 = jax.block_until_ready(gram_matrix(x2))
    ref2 = jax.block_until_ready(gram_matrix_ref(x2))
    assert gram2.shape == (B2 * C2, B2 * C2), gram2.shape
    assert jnp.allclose(gram2, ref2, rtol=2e-2, atol=1e-3)

    print("KERNEL_OK")
</pallas_src>

<mosaic_0001>
module attributes {stable_mosaic.version = 11 : i64} {
  func.func @_gram_small_kernel(%arg0: i32, %arg1: i32, %arg2: memref<16x256xf32, #tpu.memory_space<vmem>>, %arg3: memref<1x16x16xf32, #tpu.memory_space<vmem>>, %arg4: memref<16x16xf32, #tpu.memory_space<vmem>>) attributes {dimension_semantics = [#tpu.dimension_semantics<parallel>, #tpu.dimension_semantics<arbitrary>], iteration_bounds = array<i64: 1, 1>, scalar_prefetch = 0 : i64, scratch_operands = 1 : i64, tpu.core_type = #tpu.core_type<tc>, window_params = [{transform_indices = @transform_0, window_bounds = array<i64: 16, 256>}, {transform_indices = @transform_1, window_bounds = array<i64: 1, 16, 16>}]} {
    %c0_i32 = arith.constant 0 : i32
    %0 = arith.cmpi eq, %arg1, %c0_i32 : i32
    %1 = arith.extui %0 : i1 to i32
    %c0_i32_0 = arith.constant 0 : i32
    %2 = arith.cmpi ne, %1, %c0_i32_0 : i32
    scf.if %2 {
      %cst_8 = arith.constant 0.000000e+00 : f32
      %12 = vector.broadcast %cst_8 : f32 to vector<16x16xf32>
      %c0_9 = arith.constant 0 : index
      %c0_10 = arith.constant 0 : index
      %13 = vector.load %arg4[%c0_9, %c0_10] : memref<16x16xf32, #tpu.memory_space<vmem>>, vector<16x16xf32>
      tpu.vector_store %arg4[%c0_9, %c0_10], %12 {strides = array<i32>} : memref<16x16xf32, #tpu.memory_space<vmem>>, vector<16x16xf32>,
    } else {
    }
    %c0 = arith.constant 0 : index
    %c0_1 = arith.constant 0 : index
    %3 = vector.load %arg2[%c0, %c0_1] : memref<16x256xf32, #tpu.memory_space<vmem>>, vector<16x256xf32>
    %4 = arith.truncf %3 : vector<16x256xf32> to vector<16x256xbf16>
    %c0_2 = arith.constant 0 : index
    %c0_3 = arith.constant 0 : index
    %5 = vector.load %arg4[%c0_2, %c0_3] : memref<16x16xf32, #tpu.memory_space<vmem>>, vector<16x16xf32>
    %cst = arith.constant dense<0.000000e+00> : vector<16x16xf32>
    %6 = tpu.matmul %4, %4, %cst {dimension_numbers = #tpu.dot_dimension_numbers<[1], [1], [0], [0], [0, 0, 1, 0], [], []>} : vector<16x256xbf16>, vector<16x256xbf16>, vector<16x16xf32> -> vector<16x16xf32>
    %7 = arith.addf %5, %6 : vector<16x16xf32>
    %c0_4 = arith.constant 0 : index
    %c0_5 = arith.constant 0 : index
    %8 = vector.load %arg4[%c0_4, %c0_5] : memref<16x16xf32, #tpu.memory_space<vmem>>, vector<16x16xf32>
    tpu.vector_store %arg4[%c0_4, %c0_5], %7 {strides = array<i32>} : memref<16x16xf32, #tpu.memory_space<vmem>>, vector<16x16xf32>,
    %c0_i32_6 = arith.constant 0 : i32
    %9 = arith.cmpi eq, %arg1, %c0_i32_6 : i32
    %10 = arith.extui %9 : i1 to i32
    %c0_i32_7 = arith.constant 0 : i32
    %11 = arith.cmpi ne, %10, %c0_i32_7 : i32
    scf.if %11 {
      %c0_8 = arith.constant 0 : index
      %c0_9 = arith.constant 0 : index
      %12 = vector.load %arg4[%c0_8, %c0_9] : memref<16x16xf32, #tpu.memory_space<vmem>>, vector<16x16xf32>
      %cst_10 = arith.constant 4.8828125E-4 : f32
      %13 = vector.broadcast %cst_10 : f32 to vector<16x16xf32>
      %14 = arith.mulf %12, %13 : vector<16x16xf32>
      %c0_11 = arith.constant 0 : index
      %c0_12 = arith.constant 0 : index
      %c0_13 = arith.constant 0 : index
      %15 = vector.load %arg3[%c0_11, %c0_12, %c0_13] : memref<1x16x16xf32, #tpu.memory_space<vmem>>, vector<1x16x16xf32>
      %16 = vector.shape_cast %15 : vector<1x16x16xf32> to vector<16x16xf32>
      %17 = vector.shape_cast %14 : vector<16x16xf32> to vector<1x16x16xf32>
      tpu.vector_store %arg3[%c0_11, %c0_12, %c0_13], %17 {strides = array<i32>} : memref<1x16x16xf32, #tpu.memory_space<vmem>>, vector<1x16x16xf32>,
    } else {
    }
    return
  }
  func.func @transform_0(%arg0: i32, %arg1: i32) -> (i32, i32) {
    %c1_i32 = arith.constant 1 : i32
    %0 = arith.muli %arg0, %c1_i32 : i32
    %1 = arith.addi %0, %arg1 : i32
    %c0_i32 = arith.constant 0 : i32
    %c0_i32_0 = arith.constant 0 : i32
    return %c0_i32, %1 : i32, i32
  }
  func.func @transform_1(%arg0: i32, %arg1: i32) -> (i32, i32, i32) {
    %c0_i32 = arith.constant 0 : i32
    %c0_i32_0 = arith.constant 0 : i32
    %c0_i32_1 = arith.constant 0 : i32
    return %arg0, %c0_i32, %c0_i32_0 : i32, i32, i32
  }
}

</mosaic_0001>

<bundles_post_ra>
// kernel: tpu_custom_call.1
= control target key start
LH: loop header
LB: loop body
LE: loop exit
PB: predicated region body
PF: predicated region fallthrough
CT: control target
= control target key end

     0   :  { %6 = vsyncpa [#allocation4], 0  ;;  %s197_s0 = inlined_call_operand.hbm [shape: f32[16,256], index: 0, kind: input, shape index: {}]   ;;  %s198_s1 = inlined_call_operand.hbm [shape: f32[1,16,16], index: 1, kind: output, shape index: {}]  }
   0x1   :  { %7 = vsyncpa [#allocation5], 0  ;;  %s168_s6 = smov [#allocation3]  }
   0x2   :  { %s17_s7 = sshll.u32 %s168_s6, 4  ;;  %s18_s7 = int_to_ptr.vmem [resolvable:$true] %s17_s7 }
   0x3   :  { %s132_s8 = scalar_lea.vmem %s18_s7, 512  ;;  %p137_p1 = scmp.lt.s32.totalorder %s18_s7, %s18_s7 }
   0x4   :  { %p133_p0 = scmp.ne.s32.totalorder %s18_s7, %s132_s8  ;;  %p138_p2 = scmp.lt.s32.totalorder %s132_s8, %s132_s8 }
   0x6   :  { %p139_p3 = por %p138_p2, %p137_p1 }
   0x8   :  { %p140_p4 = pnand %p139_p3, %p133_p0 }
   0xa   :  { %143 = shalt.err (!%p140_p4)
}
   0xb   :  { %s169_s9 = smov 256   ;;  %s170_s10 = smov 16  }
   0xc   :  { %23 = dma.hbm_to_vmem [thread:$0]  %s197_s0, 512, %s18_s7, [#allocation4], %s169_s9, %s169_s9, %s170_s10  }
   0xd   :  { %164 = dma.done.wait [#allocation4], 512  }
   0xe   :  { %165 = vsyncadd [#allocation4], 4294966784  ;;  %vm34_vm0 = vcmask 130048   ;;  %v171_v0 = vmov 0.0   ;;  %v38_v1 = vld [vmem:[#allocation3 + $0x8] sm:$0xff]  ;;  %v40_v2 = vld [vmem:[#allocation3 + $0x18] sm:$0xff] }
   0xf   :  { %35 = vst.msk [vmem:[#allocation2] sm:$0xff] %vm34_vm0, %v171_v0  ;;  %36 = vst.msk [vmem:[#allocation2 + $0x8] sm:$0xff] %vm34_vm0, %v171_v0  ;;  %v37_v3 = vld [vmem:[#allocation3] sm:$0xff]  ;;  %v42_v4 = vpack.c.bf16 %v40_v2, %v38_v1  ;;  %v39_v5 = vld [vmem:[#allocation3 + $0x10] sm:$0xff]  ;;  %s172_s0 = smov [#allocation6]  }
  0x10   :  { %v41_v6 = vpack.c.bf16 %v39_v5, %v37_v3  ;;  %s105_s13 = sshll.u32 %s172_s0, 4  ;;  %s106_s13 = int_to_ptr.vmem [resolvable:$true] %s105_s13 }
  0x11   :  { %59 = vmatprep.subr.bf16.mxu0 %v42_v4  ;;  %77 = vmatprep.mubr.bf16.mxu0 %v42_v4  ;;  %s144_s14 = scalar_lea.vmem %s106_s13, 256  ;;  %p149_p6 = scmp.lt.s32.totalorder %s106_s13, %s106_s13 }
  0x12   :  { %60 = vmatpush1.bf16.xpose.msra.mxu0 %v41_v6  ;;  %p145_p5 = scmp.ne.s32.totalorder %s106_s13, %s144_s14  ;;  %p150_p7 = scmp.lt.s32.totalorder %s144_s14, %s144_s14 }
  0x14   :  { %p151_p8 = por %p150_p7, %p149_p6 }
  0x16   :  { %v43_v7 = vld [vmem:[#allocation2] sm:$0xff]  ;;  %v44_v11 = vld [vmem:[#allocation2 + $0x8] sm:$0xff]  ;;  %p152_p9 = pnand %p151_p8, %p145_p5 }
  0x19   :  { %78 = vmatmul.mubr.bf16.vlgmr.msra.gmra.mxu0 %v41_v6 }
  0xd9   :  { %v79_v8 = vpop.f32.mrf.mxu0 }
  0xda   :  { %v86_v9 = vadd.f32 %v79_v8, %v43_v7 }
  0xdb   :  { %v81_v10 = vpop.f32.mrf.mxu0 }
  0xdc   :  { %89 = vst.msk [vmem:[#allocation2] sm:$0xff] %vm34_vm0, %v86_v9 }
  0xdd   :  { %v82_v12 = vpop.f32.mrf.mxu0 }
  0xde   :  { %v87_v13 = vadd.f32 %v82_v12, %v44_v11 }
  0xdf   :  { %v84_v14 = vpop.f32.mrf.mxu0 }
  0xe0   :  { %90 = vst.msk [vmem:[#allocation2 + $0x8] sm:$0xff] %vm34_vm0, %v87_v13 }
  0xe3   :  { %v94_v15 = vld [vmem:[#allocation2] sm:$0xff] }
  0xe4   :  { %v96_v16 = vmul.f32 0.00048828125, %v94_v15 }
  0xe6   :  { %98 = vst.msk [vmem:[#allocation6] sm:$0xff] %vm34_vm0, %v96_v16 }
  0xe7   :  { %v95_v17 = vld [vmem:[#allocation2 + $0x8] sm:$0xff] }
  0xe8   :  { %v97_v18 = vmul.f32 0.00048828125, %v95_v17 }
  0xea   :  { %99 = vst.msk [vmem:[#allocation6 + $0x8] sm:$0xff] %vm34_vm0, %v97_v18 }
  0xeb   :  { %155 = shalt.err (!%p152_p9)
}
  0xec   :  { %s173_s15 = smov 128   ;;  %s174_s16 = smov 8  }
  0xed   :  { %111 = dma.vmem_to_hbm [thread:$0]  %s106_s13, 256, %s198_s1, [#allocation5], %s173_s15, %s173_s15, %s174_s16  }
  0xee   :  { %166 = dma.done.wait [#allocation5], 256  }
  0xef   :  { %167 = vsyncadd [#allocation5], 4294967040 }
  0xf0   :  { %115 = vsyncpa [#allocation4], 1 }
  0xf1   :  { %116 = vsyncpa [#allocation5], 1 }

</bundles_post_ra>
